<compile_context>
chip_gen: v7x
topology: tpu7x:2x2x1
jax: 0.10.0
libtpu: 0.0.40
codegen_flags: <defaults>
</compile_context>

<pallas_src>
import jax
import jax.numpy as jnp
from jax.experimental import pallas as pl
from jax.experimental.pallas import tpu as pltpu


def _round_up(x: int, m: int) -> int:
    return (x + m - 1) // m * m


def _neg_sampling_loss_kernel(inp_ref, out_ref, noise_ref, loss_ref):
    inp = inp_ref[...].astype(jnp.float32)      # (TB, E_pad)
    outv = out_ref[...].astype(jnp.float32)     # (TB, E_pad)
    noise = noise_ref[...].astype(jnp.float32)  # (TB, N, E_pad)

    # Positive score: row-wise dot product -> (TB, 1)
    pos = jnp.sum(outv * inp, axis=-1, keepdims=True)
    # log(sigmoid(pos)) = min(pos, 0) - log(1 + exp(-|pos|))   (stable)
    pos_ls = jnp.minimum(pos, 0.0) - jnp.log(1.0 + jnp.exp(-jnp.abs(pos)))

    # Negative scores: s_n = noise_n . inp  -> (TB, N)
    s = jnp.sum(noise * inp[:, None, :], axis=-1)
    # log(sigmoid(-s)) = -softplus(s) = -(max(s, 0) + log(1 + exp(-|s|)))
    neg_ls = -(jnp.maximum(s, 0.0) + jnp.log(1.0 + jnp.exp(-jnp.abs(s))))

    # Per-example log-likelihood (before the -mean done in the wrapper).
    loss_ref[...] = pos_ls + jnp.sum(neg_ls, axis=-1, keepdims=True)


def negative_sampling_loss(input_vectors, output_vectors, noise_vectors,
                           *, batch_tile=None, max_tile_bytes=8 * 1024 * 1024):
    """Pallas TPU implementation of NegativeSamplingLoss.forward."""
    B, E = input_vectors.shape
    _, N, _ = noise_vectors.shape

    # Lane-dense embedding dim: pad E up to a multiple of 128 with zeros
    # (zeros don't change any dot product).
    E_pad = _round_up(E, 128)

    # Choose batch tile: multiple of 8, sized so one step's inputs
    # ((N + 2) rows of E_pad f32 per example) stay under max_tile_bytes,
    # leaving room for double buffering inside a 32 MiB scoped-VMEM budget.
    if batch_tile is None:
        bytes_per_example = (N + 2) * E_pad * 4
        batch_tile = max(8, (max_tile_bytes // bytes_per_example) // 8 * 8)
    TB = max(8, _round_up(batch_tile, 8))
    TB = min(TB, _round_up(B, 8))
    B_pad = _round_up(B, TB)

    pad_b = B_pad - B
    pad_e = E_pad - E
    inp = jnp.pad(input_vectors, ((0, pad_b), (0, pad_e)))
    outv = jnp.pad(output_vectors, ((0, pad_b), (0, pad_e)))
    noise = jnp.pad(noise_vectors, ((0, pad_b), (0, 0), (0, pad_e)))

    grid = (B_pad // TB,)
    per_example = pl.pallas_call(
        _neg_sampling_loss_kernel,
        out_shape=jax.ShapeDtypeStruct((B_pad, 1), jnp.float32),
        grid=grid,
        in_specs=[
            pl.BlockSpec((TB, E_pad), lambda i: (i, 0)),
            pl.BlockSpec((TB, E_pad), lambda i: (i, 0)),
            pl.BlockSpec((TB, N, E_pad), lambda i: (i, 0, 0)),
        ],
        out_specs=pl.BlockSpec((TB, 1), lambda i: (i, 0)),
        compiler_params=pltpu.CompilerParams(
            dimension_semantics=("parallel",),
            vmem_limit_bytes=32 * 1024 * 1024,
        ),
    )(inp, outv, noise)

    # -mean over the TRUE batch (padded rows are sliced away).
    return -jnp.mean(per_example[:B, 0])


def _reference(input_vectors, output_vectors, noise_vectors):
    # Pure-JAX reference mirroring the PyTorch module exactly.
    pos = jnp.einsum("be,be->b", output_vectors, input_vectors)
    out_loss = jnp.log(jax.nn.sigmoid(pos))
    neg = jnp.einsum("bne,be->bn", -noise_vectors, input_vectors)
    noise_loss = jnp.sum(jnp.log(jax.nn.sigmoid(neg)), axis=1)
    return -jnp.mean(out_loss + noise_loss)


if __name__ == "__main__":
    # Small shapes; B deliberately not a multiple of the tile and E not a
    # multiple of 128 to exercise the padding + multi-step grid paths.
    B, E, N = 20, 48, 5

    key = jax.random.PRNGKey(0)
    k_in, k_out, k_noise = jax.random.split(key, 3)
    input_vectors = jax.random.normal(k_in, (B, E), dtype=jnp.float32)
    output_vectors = jax.random.normal(k_out, (B, E), dtype=jnp.float32)
    noise_vectors = jax.random.normal(k_noise, (B, N, E), dtype=jnp.float32)

    loss = negative_sampling_loss(input_vectors, output_vectors, noise_vectors,
                                  batch_tile=8)
    loss = jax.block_until_ready(loss)

    ref = _reference(input_vectors, output_vectors, noise_vectors)
    assert jnp.allclose(loss, ref, rtol=1e-5, atol=1e-5), (loss, ref)

    print("KERNEL_OK")
</pallas_src>

<mosaic_0001>
module attributes {stable_mosaic.version = 11 : i64} {
  func.func @_neg_sampling_loss_kernel(%arg0: i32, %arg1: memref<8x128xf32, #tpu.memory_space<vmem>>, %arg2: memref<8x128xf32, #tpu.memory_space<vmem>>, %arg3: memref<8x5x128xf32, #tpu.memory_space<vmem>>, %arg4: memref<8x1xf32, #tpu.memory_space<vmem>>) attributes {dimension_semantics = [#tpu.dimension_semantics<parallel>], iteration_bounds = array<i64: 3>, scalar_prefetch = 0 : i64, scratch_operands = 0 : i64, tpu.core_type = #tpu.core_type<tc>, window_params = [{transform_indices = @transform_0, window_bounds = array<i64: 8, 128>}, {transform_indices = @transform_1, window_bounds = array<i64: 8, 128>}, {transform_indices = @transform_2, window_bounds = array<i64: 8, 5, 128>}, {transform_indices = @transform_3, window_bounds = array<i64: 8, 1>}]} {
    %c0 = arith.constant 0 : index
    %c0_0 = arith.constant 0 : index
    %0 = vector.load %arg1[%c0, %c0_0] : memref<8x128xf32, #tpu.memory_space<vmem>>, vector<8x128xf32>
    %c0_1 = arith.constant 0 : index
    %c0_2 = arith.constant 0 : index
    %1 = vector.load %arg2[%c0_1, %c0_2] : memref<8x128xf32, #tpu.memory_space<vmem>>, vector<8x128xf32>
    %c0_3 = arith.constant 0 : index
    %c0_4 = arith.constant 0 : index
    %c0_5 = arith.constant 0 : index
    %2 = vector.load %arg3[%c0_3, %c0_4, %c0_5] : memref<8x5x128xf32, #tpu.memory_space<vmem>>, vector<8x5x128xf32>
    %3 = arith.mulf %1, %0 : vector<8x128xf32>
    %cst = arith.constant dense<0.000000e+00> : vector<8xf32>
    %4 = vector.multi_reduction <add>, %3, %cst [1] : vector<8x128xf32> to vector<8xf32>
    %5 = vector.shape_cast %4 : vector<8xf32> to vector<8x1xf32>
    %cst_6 = arith.constant 0.000000e+00 : f32
    %6 = vector.broadcast %cst_6 : f32 to vector<8x1xf32>
    %7 = arith.minimumf %5, %6 : vector<8x1xf32>
    %8 = math.absf %5 : vector<8x1xf32>
    %cst_7 = arith.constant 0.000000e+00 : f32
    %9 = vector.broadcast %cst_7 : f32 to vector<8x1xf32>
    %10 = arith.subf %9, %8 : vector<8x1xf32>
    %11 = math.exp %10 : vector<8x1xf32>
    %cst_8 = arith.constant 1.000000e+00 : f32
    %12 = vector.broadcast %cst_8 : f32 to vector<8x1xf32>
    %13 = arith.addf %12, %11 : vector<8x1xf32>
    %14 = math.log %13 : vector<8x1xf32>
    %15 = arith.subf %7, %14 : vector<8x1xf32>
    %16 = vector.shape_cast %0 : vector<8x128xf32> to vector<8x1x128xf32>
    %17 = vector.broadcast %16 : vector<8x1x128xf32> to vector<8x5x128xf32>
    %18 = arith.mulf %2, %17 : vector<8x5x128xf32>
    %cst_9 = arith.constant dense<0.000000e+00> : vector<8x5xf32>
    %19 = vector.multi_reduction <add>, %18, %cst_9 [2] : vector<8x5x128xf32> to vector<8x5xf32>
    %cst_10 = arith.constant 0.000000e+00 : f32
    %20 = vector.broadcast %cst_10 : f32 to vector<8x5xf32>
    %21 = arith.maximumf %19, %20 : vector<8x5xf32>
    %22 = math.absf %19 : vector<8x5xf32>
    %cst_11 = arith.constant 0.000000e+00 : f32
    %23 = vector.broadcast %cst_11 : f32 to vector<8x5xf32>
    %24 = arith.subf %23, %22 : vector<8x5xf32>
    %25 = math.exp %24 : vector<8x5xf32>
    %cst_12 = arith.constant 1.000000e+00 : f32
    %26 = vector.broadcast %cst_12 : f32 to vector<8x5xf32>
    %27 = arith.addf %26, %25 : vector<8x5xf32>
    %28 = math.log %27 : vector<8x5xf32>
    %29 = arith.addf %21, %28 : vector<8x5xf32>
    %cst_13 = arith.constant 0.000000e+00 : f32
    %30 = vector.broadcast %cst_13 : f32 to vector<8x5xf32>
    %31 = arith.subf %30, %29 : vector<8x5xf32>
    %cst_14 = arith.constant dense<0.000000e+00> : vector<8xf32>
    %32 = vector.multi_reduction <add>, %31, %cst_14 [1] : vector<8x5xf32> to vector<8xf32>
    %33 = vector.shape_cast %32 : vector<8xf32> to vector<8x1xf32>
    %34 = arith.addf %15, %33 : vector<8x1xf32>
    %c0_15 = arith.constant 0 : index
    %c0_16 = arith.constant 0 : index
    %35 = vector.load %arg4[%c0_15, %c0_16] : memref<8x1xf32, #tpu.memory_space<vmem>>, vector<8x1xf32>
    tpu.vector_store %arg4[%c0_15, %c0_16], %34 {strides = array<i32>} : memref<8x1xf32, #tpu.memory_space<vmem>>, vector<8x1xf32>,
    return
  }
  func.func @transform_0(%arg0: i32) -> (i32, i32) {
    %c0_i32 = arith.constant 0 : i32
    %c0_i32_0 = arith.constant 0 : i32
    return %arg0, %c0_i32 : i32, i32
  }
  func.func @transform_1(%arg0: i32) -> (i32, i32) {
    %c0_i32 = arith.constant 0 : i32
    %c0_i32_0 = arith.constant 0 : i32
    return %arg0, %c0_i32 : i32, i32
  }
  func.func @transform_2(%arg0: i32) -> (i32, i32, i32) {
    %c0_i32 = arith.constant 0 : i32
    %c0_i32_0 = arith.constant 0 : i32
    %c0_i32_1 = arith.constant 0 : i32
    return %arg0, %c0_i32, %c0_i32_0 : i32, i32, i32
  }
  func.func @transform_3(%arg0: i32) -> (i32, i32) {
    %c0_i32 = arith.constant 0 : i32
    %c0_i32_0 = arith.constant 0 : i32
    return %arg0, %c0_i32 : i32, i32
  }
}

</mosaic_0001>

<bundles_post_ra>
// kernel: tpu_custom_call.1
= control target key start
LH: loop header
LB: loop body
LE: loop exit
PB: predicated region body
PF: predicated region fallthrough
CT: control target
= control target key end

     0   :  { %s658_s12 = smov 0   ;;  %s746_s0 = inlined_call_operand.vmem [shape: f32[24,128], index: 0, kind: input, shape index: {}]   ;;  %s747_s1 = inlined_call_operand.vmem [shape: f32[24,128], index: 1, kind: input, shape index: {}]   ;;  %s748_s2 = inlined_call_operand.vmem [shape: f32[24,5,128], index: 2, kind: input, shape index: {}]   ;;  %s749_s3 = inlined_call_operand.vmem [shape: f32[24,1], index: 3, kind: output, shape index: {}]  }
   0x1 LB: > { %s571_s13 = sadd.s32 4294967295, %s635_s12   ;;  %p575_p0 = scmp.ge.s32.totalorder %s635_s12, 1  ;;  %s635_s12 = sphi %s658_s12, %s13_s12  }
   0x2   : > { %p156_p1 = scmp.lt.s32.totalorder %s635_s12, 4 }
   0x4   : > { %p157_p2 = pnand %p575_p0, %p156_p1 }
   0x5   : > { %p187_p3 = scmp.lt.s32.totalorder (!%p157_p2), %s571_s13, 2  ;;  %s578_s14 = sshll.u32 (!%p157_p2), %s571_s13, 3  ;;  %v232_v0 = vlaneseq (!%p157_p2)  ;;  %v637_v1 = vmov (!%p157_p2), 1966171168   ;;  %vm325_vm0 = vcmask (!%p157_p2), 1044480   ;;  %vm472_vm1 = vcmask (!%p157_p2), 1041409  }
   0x6   : > { %160 = sbr.rel (%p157_p2) target bundleno = 369 (0x171), region = 32  ;;  %p196_p4 = scmp.lt.s32.totalorder (!%p157_p2), %s578_s14, 23  ;;  %v230_v2 = vunpack.c.l.s4 (!%p157_p2), %v637_v1  ;;  %vm474_vm2 = vcmask (!%p157_p2), 1042434   ;;  %vm476_vm3 = vcmask (!%p157_p2), 1043459   ;;  %vm478_vm4 = vcmask (!%p157_p2), 1044484  }
   0x7   : > { %v233_v3 = vshrl.u32 (!%p157_p2), %v232_v0, 7  ;;  %v439_v4 = vand.u32 (!%p157_p2), 127, %v232_v0  ;;  %vm480_vm5 = vcmask (!%p157_p2), 1045509   ;;  %vm482_vm6 = vcmask (!%p157_p2), 1046534  }
   0x8   : > { %v231_v5 = vunpack.c.0.s8 (!%p157_p2), %v230_v2  ;;  %vm484_vm7 = vcmask (!%p157_p2), 1047559   ;;  %vm487_vm8 = vcmask (!%p157_p2), 39936   ;;  %vm492_vm9 = vcmask (!%p157_p2), 7168  }
   0x9   : > { %v668_v6 = vsub.s32 (!%p157_p2), %v439_v4, %v233_v3  ;;  %v279_v10 = vsub.s32 (!%p157_p2), 0, %v233_v3 }
   0xa   : > { %v234_v7 = vsub.s32 (!%p157_p2), %v231_v5, %v233_v3 }
   0xd   : > { %s751_s13 = smov (!%p187_p3, %s571_s13), 2  ;;  %s753_s14 = smov (!%p196_p4, %s578_s14), 23 }
   0xe   : > { %s666_s15 = sshll.u32 %s751_s13, 3  ;;  %s579_s19 = sshll.u32 %s753_s14, 3 }
   0xf   : > { %s190_s18 = scalar_lea.vmem %s746_s0, %s666_s15  ;;  %s677_s22 = scalar_lea.vmem %s748_s2, %s579_s19 }
  0x10   : > { %v205_v8 = vld [vmem:[%s190_s18] sm:$0xff]  ;;  %v209_v20 = vld [vmem:[%s677_s22 + $0x10] sm:$0x1f]  ;;  %v208_v21 = vld [vmem:[%s677_s22 + $0x8] sm:$0x1f]  ;;  %s194_s25 = scalar_lea.vmem %s747_s1, %s666_s15  ;;  %s204_s28 = scalar_lea.vmem %s749_s3, %s666_s15 }
  0x11   : > { %v235_v9 = vrot.slane %v205_v8, %v234_v7  ;;  %v228_v11 = vcombine.high %v205_v8, %v205_v8  ;;  %v207_v15 = vld [vmem:[%s677_s22] sm:$0x1f]  ;;  %v210_v28 = vld [vmem:[%s677_s22 + $0x18] sm:$0x1f]  ;;  %v212_v37 = vld [vmem:[%s677_s22 + $0x28] sm:$0x1f] }
  0x12   : > { %v211_v27 = vld [vmem:[%s677_s22 + $0x20] sm:$0x1f]  ;;  %v213_v44 = vld [vmem:[%s677_s22 + $0x30] sm:$0x1f]  ;;  %v214_v48 = vld [vmem:[%s677_s22 + $0x38] sm:$0x1f] }
  0x13   : > { %v251_v12 = vrot.slane %v235_v9, %v234_v7  ;;  %v243_v13 = vcombine.high %v235_v9, %v235_v9  ;;  %v242_v14 = vrot.slane %v228_v11, %v234_v7  ;;  %v206_v54 = vld [vmem:[%s194_s25] sm:$0xff] }
  0x14   : > { %v215_v56 = vmul.f32 %v206_v54, %v205_v8 }
  0x15   : > { %v280_v16 = vrot.slane %v251_v12, %v279_v10  ;;  %v273_v17 = vcombine.high %v251_v12, %v251_v12  ;;  %v265_v18 = vrot.slane %v243_v13, %v234_v7  ;;  %v258_v19 = vrot.slane %v242_v14, %v234_v7 }
  0x16   : > { %v244_v22 = vcombine.high %v242_v14, %v242_v14 }
  0x17   : > { %v317_v23 = vmul.f32 %v280_v16, %v207_v15  ;;  %v288_v24 = vrot.slane %v273_v17, %v279_v10  ;;  %v284_v25 = vrot.slane %v265_v18, %v279_v10  ;;  %v275_v26 = vcombine.high %v265_v18, %v265_v18 }
  0x18   : > { %v296_v29 = vrot.slane %v258_v19, %v279_v10  ;;  %v272_v30 = vrot.slane %v244_v22, %v234_v7  ;;  %v274_v31 = vcombine.high %v258_v19, %v258_v19 }
  0x19   : > { %v326_v32 = vsel %vm325_vm0, %v317_v23, 0.0  ;;  %v319_v33 = vmul.f32 %v288_v24, %v209_v20  ;;  %v318_v34 = vmul.f32 %v284_v25, %v208_v21  ;;  %v292_v35 = vrot.slane %v275_v26, %v279_v10 }
  0x1a   : > { %327 = vadd.xlane.f32.xlu0 %v326_v32  ;;  %v321_v36 = vmul.f32 %v296_v29, %v211_v27  ;;  %v300_v38 = vrot.slane %v272_v30, %v279_v10  ;;  %v276_v39 = vcombine.high %v272_v30, %v272_v30  ;;  %v304_v43 = vrot.slane %v274_v31, %v279_v10 }
  0x1b   : > { %v332_v40 = vsel %vm325_vm0, %v319_v33, 0.0  ;;  %v329_v41 = vsel %vm325_vm0, %v318_v34, 0.0  ;;  %v320_v42 = vmul.f32 %v292_v35, %v210_v28 }
  0x1c   : > { %333 = vadd.xlane.f32.xlu1 %v332_v40  ;;  %v322_v46 = vmul.f32 %v300_v38, %v212_v37  ;;  %v308_v47 = vrot.slane %v276_v39, %v279_v10  ;;  %v338_v49 = vsel %vm325_vm0, %v321_v36, 0.0  ;;  %v323_v50 = vmul.f32 %v304_v43, %v213_v44 }
  0x1d   : > { %v335_v45 = vsel %vm325_vm0, %v320_v42, 0.0 }
  0x1e   : > { %330 = vadd.xlane.f32.xlu0 %v329_v41  ;;  %v341_v51 = vsel %vm325_vm0, %v322_v46, 0.0  ;;  %v324_v52 = vmul.f32 %v308_v47, %v214_v48  ;;  %v344_v53 = vsel %vm325_vm0, %v323_v50, 0.0 }
  0x20   : > { %336 = vadd.xlane.f32.xlu1 %v335_v45  ;;  %v347_v55 = vsel %vm325_vm0, %v324_v52, 0.0 }
  0x22   : > { %339 = vadd.xlane.f32.xlu0 %v338_v49 }
  0x24   : > { %342 = vadd.xlane.f32.xlu1 %v341_v51 }
  0x26   : > { %345 = vadd.xlane.f32.xlu0 %v344_v53 }
  0x28   : > { %348 = vadd.xlane.f32.xlu1 %v347_v55 }
  0x2a   : > { %216 = vadd.xlane.f32.xlu0 %v215_v56 }
  0xa7   : > { %v699_v57 = vpop.xlane.xlu0 %327 }
  0xa8   : > { %v358_v58 = vand.u32 2147483647, %v699_v57  ;;  %v350_v41 = vmax.f32 %v699_v57, 0.0 }
  0xa9   : > { %v702_v59 = vpop.xlane.xlu1 %333 }
  0xaa   : > { %v366_v60 = vsub.f32 0.0, %v358_v58  ;;  %v360_v61 = vand.u32 2147483647, %v702_v59  ;;  %v352_v46 = vmax.f32 %v702_v59, 0.0 }
  0xab   : > { %v705_v62 = vpop.xlane.xlu0 %330 }
  0xac   : > { %v374_v63 = vmul.f32 1.442695, %v366_v60  ;;  %v368_v0 = vsub.f32 0.0, %v360_v61  ;;  %v359_v1 = vand.u32 2147483647, %v705_v62  ;;  %v351_v51 = vmax.f32 %v705_v62, 0.0 }
  0xad   : > { %v708_v2 = vpop.xlane.xlu1 %336 }
  0xae   : > { %593 = vpow2.f32 %v374_v63  ;;  %v378_v3 = vmul.f32 1.442695, %v368_v0  ;;  %v367_v4 = vsub.f32 0.0, %v359_v1  ;;  %v361_v5 = vand.u32 2147483647, %v708_v2 }
  0xaf   : > { %v711_v7 = vpop.xlane.xlu0 %339  ;;  %v353_v58 = vmax.f32 %v708_v2, 0.0 }
  0xb0   : > { %595 = vpow2.f32 %v378_v3  ;;  %v376_v8 = vmul.f32 1.442695, %v367_v4  ;;  %v362_v9 = vand.u32 2147483647, %v711_v7  ;;  %v369_v10 = vsub.f32 0.0, %v361_v5 }
  0xb1   : > { %v714_v11 = vpop.xlane.xlu1 %342  ;;  %v354_v63 = vmax.f32 %v711_v7, 0.0 }
  0xb2   : > { %597 = vpow2.f32 %v376_v8  ;;  %v370_v12 = vsub.f32 0.0, %v362_v9  ;;  %v363_v13 = vand.u32 2147483647, %v714_v11  ;;  %v380_v14 = vmul.f32 1.442695, %v369_v10 }
  0xb3   : > { %v717_v15 = vpop.xlane.xlu0 %345  ;;  %v355_v3 = vmax.f32 %v714_v11, 0.0 }
  0xb4   : > { %v382_v16 = vmul.f32 1.442695, %v370_v12  ;;  %v371_v17 = vsub.f32 0.0, %v363_v13  ;;  %v364_v18 = vand.u32 2147483647, %v717_v15  ;;  %599 = vpow2.f32 %v380_v14 }
  0xb5   : > { %v720_v19 = vpop.xlane.xlu1 %348  ;;  %v356_v12 = vmax.f32 %v717_v15, 0.0 }
  0xb6   : > { %601 = vpow2.f32 %v382_v16  ;;  %v384_v20 = vmul.f32 1.442695, %v371_v17  ;;  %v372_v21 = vsub.f32 0.0, %v364_v18  ;;  %v365_v22 = vand.u32 2147483647, %v720_v19 }
  0xb8   : > { %v594_v23 = vpop.eup %593  ;;  %603 = vpow2.f32 %v384_v20  ;;  %v386_v24 = vmul.f32 1.442695, %v372_v21  ;;  %v373_v26 = vsub.f32 0.0, %v365_v22 }
  0xb9   : > { %v390_v25 = vadd.f32 1.0, %v594_v23  ;;  %v357_v23 = vmax.f32 %v720_v19, 0.0 }
  0xba   : > { %v596_v27 = vpop.eup %595  ;;  %605 = vpow2.f32 %v386_v24  ;;  %v388_v29 = vmul.f32 1.442695, %v373_v26 }
  0xbb   : > { %607 = vlog2.f32 %v390_v25  ;;  %v392_v28 = vadd.f32 1.0, %v596_v27 }
  0xbc   : > { %v598_v30 = vpop.eup %597 }
  0xbd   : > { %609 = vlog2.f32 %v392_v28  ;;  %v391_v31 = vadd.f32 1.0, %v598_v30 }
  0xbe   : > { %611 = vpow2.f32 %v388_v29  ;;  %v600_v32 = vpop.eup %599 }
  0xbf   : > { %613 = vlog2.f32 %v391_v31  ;;  %v393_v34 = vadd.f32 1.0, %v600_v32 }
  0xc0   : > { %v602_v33 = vpop.eup %601 }
  0xc1   : > { %v394_v35 = vadd.f32 1.0, %v602_v33  ;;  %615 = vlog2.f32 %v393_v34 }
  0xc2   : > { %v604_v36 = vpop.eup %603 }
  0xc3   : > { %617 = vlog2.f32 %v394_v35  ;;  %v395_v37 = vadd.f32 1.0, %v604_v36  ;;  %v217_v35 = vpop.xlane.xlu0 %216 }
  0xc4   : > { %v606_v38 = vpop.eup %605  ;;  %v219_v36 = vand.u32 2147483647, %v217_v35 }
  0xc5   : > { %v608_v39 = vpop.eup %607  ;;  %619 = vlog2.f32 %v395_v37  ;;  %v396_v40 = vadd.f32 1.0, %v606_v38 }
  0xc6   : > { %v399_v42 = vmul.f32 0.6931472, %v608_v39  ;;  %v220_v37 = vsub.f32 0.0, %v219_v36 }
  0xc7   : > { %v610_v43 = vpop.eup %609  ;;  %621 = vlog2.f32 %v396_v40 }
  0xc8   : > { %v612_v44 = vpop.eup %611  ;;  %v414_v45 = vadd.f32 %v399_v42, %v350_v41  ;;  %v403_v47 = vmul.f32 0.6931472, %v610_v43  ;;  %v221_v38 = vmul.f32 1.442695, %v220_v37  ;;  %v218_v42 = vmin.f32 %v217_v35, 0.0 }
  0xc9   : > { %v614_v48 = vpop.eup %613  ;;  %v397_v49 = vadd.f32 1.0, %v612_v44 }
  0xca   : > { %v416_v50 = vadd.f32 %v403_v47, %v352_v46  ;;  %v401_v52 = vmul.f32 0.6931472, %v614_v48  ;;  %v422_v54 = vsub.f32 0.0, %v414_v45 }
  0xcb   : > { %623 = vlog2.f32 %v397_v49  ;;  %v616_v53 = vpop.eup %615 }
  0xcc   : > { %v415_v55 = vadd.f32 %v401_v52, %v351_v51  ;;  %v424_v57 = vsub.f32 0.0, %v416_v50  ;;  %v405_v60 = vmul.f32 0.6931472, %v616_v53  ;;  %v443_v62 = vrot.slane %v422_v54, %v668_v6 }
  0xcd   : > { %v618_v56 = vpop.eup %617  ;;  %625 = vpow2.f32 %v221_v38 }
  0xce   : > { %v423_v61 = vsub.f32 0.0, %v415_v55  ;;  %v407_v59 = vmul.f32 0.6931472, %v618_v56  ;;  %v417_v1 = vadd.f32 %v405_v60, %v353_v58  ;;  %v451_v2 = vrot.slane %v424_v57, %v668_v6 }
  0xcf   : > { %v620_v0 = vpop.eup %619 }
  0xd0   : > { %v447_v4 = vrot.slane %v423_v61, %v668_v6  ;;  %v418_v5 = vadd.f32 %v407_v59, %v354_v63  ;;  %v409_v8 = vmul.f32 0.6931472, %v620_v0  ;;  %v425_v10 = vsub.f32 0.0, %v417_v1 }
  0xd1   : > { %v622_v9 = vpop.eup %621 }
  0xd2   : > { %v473_v7 = vsel %vm472_vm1, %v447_v4, %v443_v62  ;;  %v426_v13 = vsub.f32 0.0, %v418_v5  ;;  %v419_v14 = vadd.f32 %v409_v8, %v355_v3  ;;  %v411_v16 = vmul.f32 0.6931472, %v622_v9 }
  0xd3   : > { %v455_v11 = vrot.slane %v425_v10, %v668_v6  ;;  %v475_v17 = vsel %vm474_vm2, %v451_v2, %v473_v7 }
  0xd4   : > { %v459_v18 = vrot.slane %v426_v13, %v668_v6  ;;  %v427_v20 = vsub.f32 0.0, %v419_v14  ;;  %v420_v21 = vadd.f32 %v411_v16, %v356_v12 }
  0xd5   : > { %v624_v22 = vpop.eup %623  ;;  %v477_v24 = vsel %vm476_vm3, %v455_v11, %v475_v17 }
  0xd6   : > { %v463_v15 = vrot.slane %v427_v20, %v668_v6  ;;  %v428_v25 = vsub.f32 0.0, %v420_v21  ;;  %v413_v26 = vmul.f32 0.6931472, %v624_v22  ;;  %v479_v27 = vsel %vm478_vm4, %v459_v18, %v477_v24 }
  0xd7   : > { %v626_v39 = vpop.eup %625 }
  0xd8   : > { %v467_v28 = vrot.slane %v428_v25, %v668_v6  ;;  %v421_v29 = vadd.f32 %v413_v26, %v357_v23  ;;  %v481_v30 = vsel %vm480_vm5, %v463_v15, %v479_v27  ;;  %v223_v40 = vadd.f32 1.0, %v626_v39 }
  0xda   : > { %v429_v31 = vsub.f32 0.0, %v421_v29  ;;  %v483_v32 = vsel %vm482_vm6, %v467_v28, %v481_v30  ;;  %627 = vlog2.f32 %v223_v40 }
  0xdc   : > { %v471_v33 = vrot.slane %v429_v31, %v668_v6 }
  0xde   : > { %v485_v19 = vsel %vm484_vm7, %v471_v33, %v483_v32 }
  0xdf   : > { %v488_v34 = vsel %vm487_vm8, %v485_v19, 0.0 }
  0xe0   : > { %489 = vadd.xlane.f32.xlu1 %v488_v34 }
  0xe4   : > { %v628_v41 = vpop.eup %627 }
  0xe5   : > { %v225_v43 = vmul.f32 0.6931472, %v628_v41 }
  0xe7   : > { %v226_v44 = vsub.f32 %v218_v42, %v225_v43 }
 0x16d   : > { %v490_v6 = vpop.xlane.xlu1 %489 }
 0x16e   : > { %v491_v45 = vadd.f32 %v490_v6, %v226_v44 }
 0x170   : > { %493 = vst.msk [vmem:[%s204_s28] sm:$0xff] %vm492_vm9, %v491_v45 }
 0x171 PF: > { %s13_s12 = sadd.s32 1, %s635_s12  }
 0x172   : > { %p10_p5 = scmp.ge.s32.totalorder %s13_s12, 5  }
 0x174   :  { %12 = sbr.rel (!%p10_p5) target bundleno = 1 (0x1), region = 68 }

</bundles_post_ra>
